<compile_context>
chip_gen: v6e
topology: v6e:2x2x1
jax: 0.10.0
libtpu: 0.0.40
codegen_flags: <defaults>
</compile_context>

<pallas_src>
import functools

import jax
import jax.numpy as jnp
from jax import lax
from jax.experimental import pallas as pl
from jax.experimental.pallas import tpu as pltpu


def _focal_loss_kernel(targets_ref, logits_ref, alpha_ref, out_ref, acc_ref, *,
                       gamma, n_true, n_inner):
    j = pl.program_id(0)          # 'parallel' axis (megacore split, 1 per TC)
    i = pl.program_id(1)          # 'arbitrary' reduction axis over batch tiles

    @pl.when(i == 0)
    def _init():
        acc_ref[...] = jnp.zeros_like(acc_ref)

    logits = logits_ref[...].astype(jnp.float32)      # (C, TILE_N), classes on sublanes
    tgt = targets_ref[...]                            # (1, TILE_N) int32, lane-dense
    alpha = alpha_ref[...].astype(jnp.float32)        # (C, 1)

    c, tn = logits.shape
    cls = jax.lax.broadcasted_iota(jnp.int32, (c, tn), 0)    # class id per sublane
    onehot = cls == tgt                                       # (C, TILE_N)

    # Numerically-stable softmax cross entropy along the (small) class axis.
    m = jnp.max(logits, axis=0, keepdims=True)                # (1, TILE_N)
    shifted = logits - m
    e = jnp.exp(shifted)                                      # (C, TILE_N)  EUP
    sum_e = jnp.sum(e, axis=0, keepdims=True)                 # (1, TILE_N)
    tgt_shifted = jnp.sum(jnp.where(onehot, shifted, 0.0), axis=0, keepdims=True)

    ce = jnp.log(sum_e) - tgt_shifted                         # (1, TILE_N)
    # pt = exp(-ce) on the EUP: identical to exp(tgt_shifted)/sum_e but avoids a
    # (C, TILE_N) select + sublane reduce and the f32 divide (per review).
    pt = jnp.exp(-ce)

    one_m_pt = 1.0 - pt
    if gamma == 2.0:                                          # static specialization
        mod = one_m_pt * one_m_pt
    elif float(gamma).is_integer() and gamma >= 0.0:
        mod = lax.integer_pow(one_m_pt, int(gamma))
    else:
        mod = jnp.power(jnp.maximum(one_m_pt, 0.0), jnp.float32(gamma))

    # alpha.gather(0, targets) -> per-sample class weight.
    at = jnp.sum(jnp.where(onehot, alpha, 0.0), axis=0, keepdims=True)
    focal = at * (mod * ce)                                   # (1, TILE_N)

    # Mask columns past the true batch size.  col is computed from the
    # *unclamped* grid position, so a redundant (clamped) boundary step and the
    # unspecified tail of a partial boundary block both contribute exactly 0.
    col = ((j * n_inner + i) * tn
           + jax.lax.broadcasted_iota(jnp.int32, (1, tn), 1))
    focal = jnp.where(col < n_true, focal, 0.0)

    acc_ref[...] += focal                                     # VPU only in hot loop

    @pl.when(i == n_inner - 1)
    def _finish():
        out_ref[0, 0] = jnp.sum(acc_ref[...])                 # one XLU reduce per core


def _tensorcores_per_device():
    """Best-effort TensorCore count behind one pallas_call (megacore width)."""
    try:
        info = pltpu.get_tpu_info()
        for attr in ("num_cores", "num_tensorcores", "tensorcores_per_chip",
                     "tensor_cores_per_chip", "cores_per_chip"):
            v = getattr(info, attr, None)
            if isinstance(v, int) and 1 <= v <= 8:
                return min(v, 2)
    except Exception:
        pass
    try:
        kind = jax.devices()[0].device_kind.lower()
    except Exception:
        return 1
    if any(s in kind for s in ("v5e", "v5 lite", "v5lite", "v6e", "v6 lite", "v6lite")):
        return 1          # single TensorCore per chip (v5e / v6e)
    if any(s in kind for s in ("v4", "v5p", "v7")):
        return 2          # megacore chips expose 2 TensorCores per device
    return 1


def focal_loss_pallas(logits, targets, alpha=None, gamma=2.0, *,
                      class_major=False, max_tile_n=32768,
                      vmem_budget_bytes=20 * 1024 * 1024):
    """Mean focal loss (reduction='mean').

    logits: (N, C) float32/bf16, or (C, N) if class_major=True (preferred: the
            producing classifier matmul can emit class-major directly and skip
            the transposed HBM copy).
    targets: (N,) int; alpha: (C,) float or None.
    """
    if class_major:
        c, n = logits.shape
        logits_cm = logits                    # already (C, N): no extra HBM pass
    else:
        n, c = logits.shape
        # NOTE: this materializes one transposed copy of the logits in HBM.
        # For peak performance have the producer emit (C, N) (class_major=True).
        logits_cm = logits.T

    if alpha is None:
        alpha = jnp.ones((c,), dtype=jnp.float32)
    alpha_col = jnp.asarray(alpha, dtype=jnp.float32).reshape(c, 1)
    targets_row = targets.astype(jnp.int32).reshape(1, n)     # lane-dense, tiny

    # ---- tile / grid selection --------------------------------------------
    n_cores = _tensorcores_per_device()
    c_pad = pl.cdiv(c, 8) * 8
    itemsize = jnp.dtype(logits_cm.dtype).itemsize
    # VMEM bytes per batch column: double-buffered logits + targets blocks, the
    # f32 accumulator row, and ~4 live (C, tile_n) f32 temporaries in the body.
    bytes_per_col = 2 * (c_pad * itemsize + 4) + 4 + (4 * c_pad + 8) * 4
    vmem_cap = max(128, (vmem_budget_bytes // bytes_per_col) // 128 * 128)
    max_tile = max(128, min((int(max_tile_n) // 128) * 128, vmem_cap))

    if n <= max_tile and (n_cores <= 1 or n <= 128):
        # One block covering the full batch (block == full array, so N need not
        # be a multiple of 128 and nothing is padded anywhere).
        tile_n, n_outer, n_inner, n_blocks = n, 1, 1, 1
    else:
        n_outer = n_cores if (n_cores > 1 and n > 128) else 1
        cols_per_core = pl.cdiv(n, n_outer)
        tile_n = min(pl.cdiv(cols_per_core, 128) * 128, max_tile)
        n_blocks = pl.cdiv(n, tile_n)
        n_outer = min(n_outer, n_blocks)
        n_inner = pl.cdiv(n_blocks, n_outer)

    # Clamp the block index so a grid point past the last real block re-reads a
    # valid block (no OOB DMA); its contribution is masked out in-kernel.
    def blk(j, i):
        return (0, jnp.minimum(j * n_inner + i, n_blocks - 1))

    kernel = functools.partial(_focal_loss_kernel, gamma=float(gamma),
                               n_true=n, n_inner=n_inner)

    partial_sums = pl.pallas_call(
        kernel,
        out_shape=jax.ShapeDtypeStruct((n_outer, 1), jnp.float32),
        grid=(n_outer, n_inner),
        in_specs=[
            pl.BlockSpec((1, tile_n), blk),                    # targets (1, N)
            pl.BlockSpec((c, tile_n), blk),                    # logits  (C, N)
            pl.BlockSpec((c, 1), lambda j, i: (0, 0)),         # alpha, resident
        ],
        out_specs=pl.BlockSpec((1, 1), lambda j, i: (j, 0),
                               memory_space=pltpu.MemorySpace.SMEM),
        scratch_shapes=[pltpu.VMEM((1, tile_n), jnp.float32)],  # lane-dense acc
        compiler_params=pltpu.CompilerParams(
            dimension_semantics=("parallel", "arbitrary"),
            vmem_limit_bytes=32 * 1024 * 1024),
    )(targets_row, logits_cm, alpha_col)

    # One partial sum per outer (per-core) slice; finish the mean here.
    return jnp.sum(partial_sums) / jnp.float32(n)


def focal_loss_ref(logits, targets, alpha, gamma=2.0):
    """Pure-JAX reference mirroring the PyTorch module (reduction='mean')."""
    logp = jax.nn.log_softmax(logits.astype(jnp.float32), axis=-1)
    ce = -jnp.take_along_axis(logp, targets[:, None], axis=-1)[:, 0]
    pt = jnp.exp(-ce)
    focal = (1.0 - pt) ** gamma * ce
    if alpha is not None:
        focal = alpha[targets] * focal
    return focal.mean()


if __name__ == "__main__":
    key = jax.random.PRNGKey(0)
    k1, k2, k3, k4, k5, k6 = jax.random.split(key, 6)

    C = 4
    alpha = jnp.array([0.4, 0.3, 0.2, 0.1], dtype=jnp.float32)  # class weights
    gamma = 2.0

    # 1) Tiny batch: single full-array block, grid (1,1), no padding anywhere.
    N1 = 8
    logits1 = jax.random.normal(k1, (N1, C), dtype=jnp.float32)
    targets1 = jax.random.randint(k2, (N1,), 0, C, dtype=jnp.int32)
    loss1 = focal_loss_pallas(logits1, targets1, alpha, gamma)
    jax.block_until_ready(loss1)
    ref1 = focal_loss_ref(logits1, targets1, alpha, gamma)
    assert jnp.allclose(loss1, ref1, atol=1e-5, rtol=1e-5), (loss1, ref1)

    # 2) Class-major (C, N) input: no wrapper transpose HBM pass; ragged batch
    #    exercising boundary-block padding + the global-column mask.
    N2 = 300
    logits2_cm = jax.random.normal(k3, (C, N2), dtype=jnp.float32)   # (C, N)
    targets2 = jax.random.randint(k4, (N2,), 0, C, dtype=jnp.int32)
    loss2 = focal_loss_pallas(logits2_cm, targets2, alpha, gamma, class_major=True)
    jax.block_until_ready(loss2)
    ref2 = focal_loss_ref(logits2_cm.T, targets2, alpha, gamma)
    assert jnp.allclose(loss2, ref2, atol=1e-5, rtol=1e-5), (loss2, ref2)

    # 3) Force the multi-block reduction path (small max_tile_n): exercises the
    #    VMEM accumulator, the clamped index map and the final pl.when reduce.
    loss3 = focal_loss_pallas(logits2_cm, targets2, alpha, gamma,
                              class_major=True, max_tile_n=128)
    jax.block_until_ready(loss3)
    assert jnp.allclose(loss3, ref2, atol=1e-5, rtol=1e-5), (loss3, ref2)

    # 4) bf16 logits (halved HBM stream), no alpha.
    logits4 = jax.random.normal(k5, (N2, C), dtype=jnp.float32).astype(jnp.bfloat16)
    targets4 = jax.random.randint(k6, (N2,), 0, C, dtype=jnp.int32)
    loss4 = focal_loss_pallas(logits4, targets4, None, gamma)
    jax.block_until_ready(loss4)
    ref4 = focal_loss_ref(logits4, targets4, None, gamma)
    assert jnp.allclose(loss4, ref4, atol=1e-4, rtol=1e-4), (loss4, ref4)

    print("KERNEL_OK")
</pallas_src>

<mosaic_0001>
module attributes {stable_mosaic.version = 11 : i64} {
  func.func @_focal_loss_kernel(%arg0: i32, %arg1: i32, %arg2: memref<1x8xi32, #tpu.memory_space<vmem>>, %arg3: memref<4x8xf32, #tpu.memory_space<vmem>>, %arg4: memref<4x1xf32, #tpu.memory_space<vmem>>, %arg5: memref<1x1xf32, #tpu.memory_space<smem>>, %arg6: memref<1x8xf32, #tpu.memory_space<vmem>>) attributes {dimension_semantics = [#tpu.dimension_semantics<parallel>, #tpu.dimension_semantics<arbitrary>], iteration_bounds = array<i64: 1, 1>, scalar_prefetch = 0 : i64, scratch_operands = 1 : i64, tpu.core_type = #tpu.core_type<tc>, window_params = [{transform_indices = @transform_0, window_bounds = array<i64: 1, 8>}, {transform_indices = @transform_1, window_bounds = array<i64: 4, 8>}, {pipeline_mode = #tpu.pipeline_mode<synchronous>, transform_indices = @transform_2, window_bounds = array<i64: 4, 1>}, {transform_indices = @transform_3, window_bounds = array<i64: 1, 1>}]} {
    %c0_i32 = arith.constant 0 : i32
    %0 = arith.cmpi eq, %arg1, %c0_i32 : i32
    %1 = arith.extui %0 : i1 to i32
    %c0_i32_0 = arith.constant 0 : i32
    %2 = arith.cmpi ne, %1, %c0_i32_0 : i32
    scf.if %2 {
      %cst_21 = arith.constant 0.000000e+00 : f32
      %52 = vector.broadcast %cst_21 : f32 to vector<1x8xf32>
      %c0_22 = arith.constant 0 : index
      %c0_23 = arith.constant 0 : index
      %53 = vector.load %arg6[%c0_22, %c0_23] : memref<1x8xf32, #tpu.memory_space<vmem>>, vector<1x8xf32>
      tpu.vector_store %arg6[%c0_22, %c0_23], %52 {strides = array<i32>} : memref<1x8xf32, #tpu.memory_space<vmem>>, vector<1x8xf32>,
    } else {
    }
    %c0 = arith.constant 0 : index
    %c0_1 = arith.constant 0 : index
    %3 = vector.load %arg3[%c0, %c0_1] : memref<4x8xf32, #tpu.memory_space<vmem>>, vector<4x8xf32>
    %c0_2 = arith.constant 0 : index
    %c0_3 = arith.constant 0 : index
    %4 = vector.load %arg2[%c0_2, %c0_3] : memref<1x8xi32, #tpu.memory_space<vmem>>, vector<1x8xi32>
    %c0_4 = arith.constant 0 : index
    %c0_5 = arith.constant 0 : index
    %5 = vector.load %arg4[%c0_4, %c0_5] : memref<4x1xf32, #tpu.memory_space<vmem>>, vector<4x1xf32>
    %6 = tpu.iota {dimensions = array<i32: 0>} : vector<4x8xi32>
    %7 = vector.broadcast %4 : vector<1x8xi32> to vector<4x8xi32>
    %8 = arith.cmpi eq, %6, %7 : vector<4x8xi32>
    %cst = arith.constant dense<0xFF800000> : vector<8xf32>
    %9 = vector.multi_reduction <maximumf>, %3, %cst [0] : vector<4x8xf32> to vector<8xf32>
    %10 = vector.shape_cast %9 : vector<8xf32> to vector<1x8xf32>
    %11 = vector.broadcast %10 : vector<1x8xf32> to vector<4x8xf32>
    %12 = arith.subf %3, %11 : vector<4x8xf32>
    %13 = math.exp %12 : vector<4x8xf32>
    %cst_6 = arith.constant dense<0.000000e+00> : vector<8xf32>
    %14 = vector.multi_reduction <add>, %13, %cst_6 [0] : vector<4x8xf32> to vector<8xf32>
    %15 = vector.shape_cast %14 : vector<8xf32> to vector<1x8xf32>
    %cst_7 = arith.constant 0.000000e+00 : f32
    %16 = vector.broadcast %cst_7 : f32 to vector<4x8xf32>
    %17 = arith.select %8, %12, %16 : vector<4x8xi1>, vector<4x8xf32>
    %cst_8 = arith.constant dense<0.000000e+00> : vector<8xf32>
    %18 = vector.multi_reduction <add>, %17, %cst_8 [0] : vector<4x8xf32> to vector<8xf32>
    %19 = vector.shape_cast %18 : vector<8xf32> to vector<1x8xf32>
    %20 = math.log %15 : vector<1x8xf32>
    %21 = arith.subf %20, %19 : vector<1x8xf32>
    %cst_9 = arith.constant 0.000000e+00 : f32
    %22 = vector.broadcast %cst_9 : f32 to vector<1x8xf32>
    %23 = arith.subf %22, %21 : vector<1x8xf32>
    %24 = math.exp %23 : vector<1x8xf32>
    %cst_10 = arith.constant 1.000000e+00 : f32
    %25 = vector.broadcast %cst_10 : f32 to vector<1x8xf32>
    %26 = arith.subf %25, %24 : vector<1x8xf32>
    %27 = arith.mulf %26, %26 : vector<1x8xf32>
    %cst_11 = arith.constant 0.000000e+00 : f32
    %28 = vector.shape_cast %5 : vector<4x1xf32> to vector<4x1xf32>
    %29 = vector.broadcast %28 : vector<4x1xf32> to vector<4x8xf32>
    %30 = vector.broadcast %cst_11 : f32 to vector<4x8xf32>
    %31 = arith.select %8, %29, %30 : vector<4x8xi1>, vector<4x8xf32>
    %cst_12 = arith.constant dense<0.000000e+00> : vector<8xf32>
    %32 = vector.multi_reduction <add>, %31, %cst_12 [0] : vector<4x8xf32> to vector<8xf32>
    %33 = vector.shape_cast %32 : vector<8xf32> to vector<1x8xf32>
    %34 = arith.mulf %27, %21 : vector<1x8xf32>
    %35 = arith.mulf %33, %34 : vector<1x8xf32>
    %c1_i32 = arith.constant 1 : i32
    %36 = arith.muli %arg0, %c1_i32 : i32
    %37 = arith.addi %36, %arg1 : i32
    %c8_i32 = arith.constant 8 : i32
    %38 = arith.muli %37, %c8_i32 : i32
    %39 = tpu.iota {dimensions = array<i32: 1>} : vector<1x8xi32>
    %40 = vector.broadcast %38 : i32 to vector<1x8xi32>
    %41 = arith.addi %40, %39 : vector<1x8xi32>
    %c8_i32_13 = arith.constant 8 : i32
    %42 = vector.broadcast %c8_i32_13 : i32 to vector<1x8xi32>
    %43 = arith.cmpi slt, %41, %42 : vector<1x8xi32>
    %cst_14 = arith.constant 0.000000e+00 : f32
    %44 = vector.broadcast %cst_14 : f32 to vector<1x8xf32>
    %45 = arith.select %43, %35, %44 : vector<1x8xi1>, vector<1x8xf32>
    %c0_15 = arith.constant 0 : index
    %c0_16 = arith.constant 0 : index
    %46 = vector.load %arg6[%c0_15, %c0_16] : memref<1x8xf32, #tpu.memory_space<vmem>>, vector<1x8xf32>
    %47 = arith.addf %46, %45 : vector<1x8xf32>
    %c0_17 = arith.constant 0 : index
    %c0_18 = arith.constant 0 : index
    %48 = vector.load %arg6[%c0_17, %c0_18] : memref<1x8xf32, #tpu.memory_space<vmem>>, vector<1x8xf32>
    tpu.vector_store %arg6[%c0_17, %c0_18], %47 {strides = array<i32>} : memref<1x8xf32, #tpu.memory_space<vmem>>, vector<1x8xf32>,
    %c0_i32_19 = arith.constant 0 : i32
    %49 = arith.cmpi eq, %arg1, %c0_i32_19 : i32
    %50 = arith.extui %49 : i1 to i32
    %c0_i32_20 = arith.constant 0 : i32
    %51 = arith.cmpi ne, %50, %c0_i32_20 : i32
    scf.if %51 {
      %c0_21 = arith.constant 0 : index
      %c0_22 = arith.constant 0 : index
      %52 = vector.load %arg6[%c0_21, %c0_22] : memref<1x8xf32, #tpu.memory_space<vmem>>, vector<1x8xf32>
      %53 = vector.shape_cast %52 : vector<1x8xf32> to vector<1x1x8xf32>
      %cst_23 = arith.constant dense<0.000000e+00> : vector<1xf32>
      %54 = vector.multi_reduction <add>, %53, %cst_23 [1, 2] : vector<1x1x8xf32> to vector<1xf32>
      %55 = vector.shape_cast %54 : vector<1xf32> to vector<1x1x1xf32>
      %56 = vector.extract %55[0, 0, 0] : f32 from vector<1x1x1xf32>
      %c0_24 = arith.constant 0 : index
      %c0_25 = arith.constant 0 : index
      %57 = memref.load %arg5[%c0_24, %c0_25] : memref<1x1xf32, #tpu.memory_space<smem>>
      memref.store %56, %arg5[%c0_24, %c0_25] : memref<1x1xf32, #tpu.memory_space<smem>>
    } else {
    }
    return
  }
  func.func @transform_0(%arg0: i32, %arg1: i32) -> (i32, i32) {
    %c1_i32 = arith.constant 1 : i32
    %0 = arith.muli %arg0, %c1_i32 : i32
    %1 = arith.addi %0, %arg1 : i32
    %c0_i32 = arith.constant 0 : i32
    %2 = arith.minsi %1, %c0_i32 : i32
    %c0_i32_0 = arith.constant 0 : i32
    %c0_i32_1 = arith.constant 0 : i32
    return %c0_i32_0, %2 : i32, i32
  }
  func.func @transform_1(%arg0: i32, %arg1: i32) -> (i32, i32) {
    %c1_i32 = arith.constant 1 : i32
    %0 = arith.muli %arg0, %c1_i32 : i32
    %1 = arith.addi %0, %arg1 : i32
    %c0_i32 = arith.constant 0 : i32
    %2 = arith.minsi %1, %c0_i32 : i32
    %c0_i32_0 = arith.constant 0 : i32
    %c0_i32_1 = arith.constant 0 : i32
    return %c0_i32_0, %2 : i32, i32
  }
  func.func @transform_2(%arg0: i32, %arg1: i32) -> (i32, i32) {
    %c0_i32 = arith.constant 0 : i32
    %c0_i32_0 = arith.constant 0 : i32
    %c0_i32_1 = arith.constant 0 : i32
    return %c0_i32, %c0_i32_0 : i32, i32
  }
  func.func @transform_3(%arg0: i32, %arg1: i32) -> (i32, i32) {
    %c0_i32 = arith.constant 0 : i32
    %c0_i32_0 = arith.constant 0 : i32
    return %arg0, %c0_i32 : i32, i32
  }
}

</mosaic_0001>

<bundles_post_ra>
// kernel: tpu_custom_call.1
= control target key start
LH: loop header
LB: loop body
LE: loop exit
PB: predicated region body
PF: predicated region fallthrough
CT: control target
= control target key end

     0   :  { %vm82_vm0 = vcmask 60416   ;;  %v204_v2 = vmov 0   ;;  %s248_s0 = inlined_call_operand.vmem [shape: s32[1,8], index: 0, kind: input, shape index: {}]   ;;  %s249_s1 = inlined_call_operand.vmem [shape: f32[4,8], index: 1, kind: input, shape index: {}]   ;;  %s250_s2 = inlined_call_operand.vmem [shape: f32[4,1], index: 2, kind: input, shape index: {}]   ;;  %s251_s3 = inlined_call_operand.hbm [shape: f32[1,1], index: 3, kind: output, shape index: {}]  }
   0x1   :  { %v74_v0 = vld [vmem:[%s250_s2] sm:$0xf]  ;;  %187 = vset.pattern.permute.xlu0 %v204_v2 }
   0x2   :  { %v72_v1 = vld [vmem:[%s249_s1] sm:$0xf] }
   0x3   :  { %8 = vsyncpa [#allocation4], 0  ;;  %118 = vperm.xlu0 %187, %v74_v0   ;;  %v83_v3 = vsel %vm82_vm0, %v72_v1, -inf  ;;  %vm70_vm1 = vcmask 57344   ;;  %v205_v5 = vmov 0.0   ;;  %v75_v16 = vlaneseq  ;;  %s206_s16 = smov [#allocation3]  }
   0x4   :  { %v84_v4 = vrot.slane %v83_v3, 4  ;;  %71 = vst.msk [vmem:[#allocation2] sm:$0x1] %vm70_vm1, %v205_v5  ;;  %v181_v19 = vld [vmem:[%s248_s0] ss:$0 sm:$0xff] }
   0x5   :  { %v76_v18 = vshrl.u32 %v75_v16, 7  ;;  %v134_v47 = vand.u32 127, %v75_v16 }
   0x6   :  { %v85_v6 = vmax.f32 %v83_v3, %v84_v4 }
   0x7   :  { %vm81_vm2 = vcmp.eq.s32.totalorder %v76_v18, %v181_v19  ;;  %vm137_vm3 = vcmp.lt.s32.totalorder %v134_v47, 8 }
   0x8   :  { %v86_v7 = vrot.slane %v85_v6, 2 }
   0xa   :  { %v87_v8 = vmax.f32 %v85_v6, %v86_v7 }
   0xb   :  { %v139_v52 = vld [vmem:[#allocation2] sm:$0x1] }
   0xc   :  { %v88_v9 = vrot.slane %v87_v8, 1 }
   0xe   :  { %v89_v10 = vmax.f32 %v87_v8, %v88_v9 }
  0x10   :  { %v90_v11 = vsub.f32 %v72_v1, %v89_v10 }
  0x12   :  { %v91_v12 = vmul.f32 1.442695, %v90_v11  ;;  %v100_v22 = vsel %vm81_vm2, %v90_v11, 0.0 }
  0x13   :  { %v101_v24 = vsel %vm82_vm0, %v100_v22, 0.0 }
  0x14   :  { %188 = vpow2.f32 %v91_v12  ;;  %v102_v26 = vrot.slane %v101_v24, 4 }
  0x16   :  { %v103_v27 = vadd.f32 %v102_v26, %v101_v24 }
  0x18   :  { %v104_v28 = vrot.slane %v103_v27, 2 }
  0x1a   :  { %v105_v29 = vadd.f32 %v104_v28, %v103_v27 }
  0x1c   :  { %v106_v30 = vrot.slane %v105_v29, 1 }
  0x1e   :  { %v107_v32 = vadd.f32 %v106_v30, %v105_v29 }
  0x21   :  { %v189_v13 = vpop.eup %188 }
  0x22   :  { %v93_v14 = vsel %vm82_vm0, %v189_v13, 0.0 }
  0x23   :  { %v94_v15 = vrot.slane %v93_v14, 4 }
  0x25   :  { %v95_v17 = vadd.f32 %v94_v15, %v93_v14 }
  0x27   :  { %v96_v20 = vrot.slane %v95_v17, 2 }
  0x29   :  { %v97_v21 = vadd.f32 %v96_v20, %v95_v17 }
  0x2b   :  { %v98_v23 = vrot.slane %v97_v21, 1 }
  0x2d   :  { %v99_v25 = vadd.f32 %v98_v23, %v97_v21 }
  0x2f   :  { %190 = vlog2.f32 %v99_v25 }
  0x3c   :  { %v191_v31 = vpop.eup %190 }
  0x3d   :  { %v109_v33 = vmul.f32 0.6931472, %v191_v31 }
  0x3f   :  { %v110_v34 = vsub.f32 %v109_v33, %v107_v32 }
  0x41   :  { %v111_v35 = vsub.f32 0.0, %v110_v34 }
  0x43   :  { %v112_v36 = vmul.f32 1.442695, %v111_v35 }
  0x45   :  { %192 = vpow2.f32 %v112_v36 }
  0x52   :  { %v193_v37 = vpop.eup %192 }
  0x53   :  { %v114_v41 = vsub.f32 1.0, %v193_v37 }
  0x55   :  { %v115_v44 = vmul.f32 %v114_v41, %v114_v41 }
  0x57   :  { %v129_v49 = vmul.f32 %v115_v44, %v110_v34 }
  0x7e   :  { %v119_v38 = vpop.permute.xlu0 %118 }
  0x7f   :  { %v121_v39 = vsel %vm81_vm2, %v119_v38, 0.0 }
  0x80   :  { %v122_v40 = vsel %vm82_vm0, %v121_v39, 0.0 }
  0x81   :  { %v123_v42 = vrot.slane %v122_v40, 4 }
  0x83   :  { %v124_v43 = vadd.f32 %v123_v42, %v122_v40 }
  0x85   :  { %v125_v45 = vrot.slane %v124_v43, 2 }
  0x87   :  { %v126_v46 = vadd.f32 %v125_v45, %v124_v43 }
  0x89   :  { %v127_v48 = vrot.slane %v126_v46, 1 }
  0x8b   :  { %v128_v50 = vadd.f32 %v127_v48, %v126_v46 }
  0x8d   :  { %v130_v51 = vmul.f32 %v129_v49, %v128_v50 }
  0x8f   :  { %v138_v53 = vsel %vm137_vm3, %v130_v51, 0.0 }
  0x90   :  { %v140_v54 = vadd.f32 %v139_v52, %v138_v53 }
  0x92   :  { %142 = vst.msk [vmem:[#allocation2] sm:$0x1] %vm70_vm1, %v140_v54 }
  0x99   :  { %v146_v55 = vld [vmem:[#allocation2] sm:$0x1] }
  0x9a   :  { %v147_v56 = vsel %vm70_vm1, %v146_v55, 0.0 }
  0x9b   :  { %148 = vadd.xlane.f32.xlu0 %v147_v56 }
 0x124   :  { %v149_v57 = vpop.xlane.xlu0 %148 }
 0x125   :  { %v150_v58 = vrot.slane %v149_v57, 4 }
 0x127   :  { %v151_v59 = vadd.f32 %v150_v58, %v149_v57 }
 0x129   :  { %v152_v60 = vrot.slane %v151_v59, 2 }
 0x12b   :  { %v153_v61 = vadd.f32 %v152_v60, %v151_v59 }
 0x12d   :  { %v154_v62 = vrot.slane %v153_v61, 1 }
 0x12f   :  { %v155_v63 = vadd.f32 %v154_v62, %v153_v61 }
 0x131   :  { %182 = vpush %v155_v63 }
 0x162   :  { %s183_s0 = spop %182 }
 0x163   :  { %158 = sst [smem:[#allocation3]] %s183_s0 }
 0x164   :  { %166 = dma.smem_to_hbm %s206_s16, 16, %s251_s3, [#allocation4]  }
 0x165   :  { %202 = dma.done.wait [#allocation4], 16  }
 0x166   :  { %203 = vsyncadd [#allocation4], 4294967280 }
 0x167   :  { %170 = sfence }
 0x168   :  { %171 = vsyncpa [#allocation4], 1 }

</bundles_post_ra>
